<compile_context>
chip_gen: v7x
topology: tpu7x:2x2x1
jax: 0.10.0
libtpu: 0.0.40
codegen_flags: <defaults>
</compile_context>

<pallas_src>
import jax
import jax.numpy as jnp
from jax.experimental import pallas as pl
from jax.experimental.pallas import tpu as pltpu

# ---- module hyper-parameters (the PyTorch __init__ arguments) ---------------
NUM_FILTERS = 4       # num_filters
KERNEL_SIZE = 5       # kernel_size
HIDDEN_SIZE = 32      # hidden_size
POOL_SIZE   = 2       # pooling_size
SEQ_LEN     = 100     # hard-coded in the module
CONV_LEN    = SEQ_LEN - KERNEL_SIZE + 1        # 96
POOL_LEN    = CONV_LEN // POOL_SIZE            # 48 (MaxPool1d floor)
FLAT_LEN    = NUM_FILTERS * POOL_LEN           # 192
IN_ROWS     = SEQ_LEN + 1                      # +1 ones row (conv bias folded in)

MXU_DTYPE = jnp.bfloat16   # matmul-operand dtype (accumulation stays f32)
LANE_TILE = 2048           # default batch lanes per grid step (multiple of 128)


def _round_up(x, m):
    return ((x + m - 1) // m) * m


# ----------------------------- kernel ----------------------------------------
def _relevancy_kernel(xq_ref, xp_ref,
                      toe_q_ref, toe_p_ref,
                      fcqw_ref, fcqb_ref, fcpw_ref, fcpb_ref,
                      o1qw_ref, o1pw_ref, o1b_ref,
                      o2w_ref, o2b_ref, out_ref):
    """One batch tile.  xq/xp: (IN_ROWS, Btile) bf16; out: (1, Btile) f32."""

    def conv_branch(x_ref, toe_ref):
        # Conv1d(in=1) + bias as one MXU matmul against the Toeplitz weight;
        # the bias lives in the last Toeplitz column, matched by the constant
        # ones row appended to the input in the wrapper.
        conv = jnp.dot(toe_ref[...], x_ref[...],
                       preferred_element_type=jnp.float32)        # (2*FLAT, B)
        conv = jnp.maximum(conv, 0.0)                              # ReLU
        # MaxPool1d(2): rows [0:FLAT] are even conv positions, [FLAT:] odd.
        pooled = jnp.maximum(conv[:FLAT_LEN, :], conv[FLAT_LEN:, :])
        return pooled.astype(MXU_DTYPE)                            # (FLAT, B)

    pq = conv_branch(xq_ref, toe_q_ref)
    pp = conv_branch(xp_ref, toe_p_ref)

    # Per-branch FC layers (fc_query has ReLU, fc_passage does not).
    hq = jnp.dot(fcqw_ref[...], pq,
                 preferred_element_type=jnp.float32) + fcqb_ref[...]
    hq = jnp.maximum(hq, 0.0).astype(MXU_DTYPE)                    # (H, B)
    hp = (jnp.dot(fcpw_ref[...], pp,
                  preferred_element_type=jnp.float32) + fcpb_ref[...]
          ).astype(MXU_DTYPE)                                      # (H, B)

    # output Linear(2H -> H): cat(hq, hp) is never materialised; the weight is
    # split into its query/passage halves and the two products are summed.
    o1 = (jnp.dot(o1qw_ref[...], hq, preferred_element_type=jnp.float32)
          + jnp.dot(o1pw_ref[...], hp, preferred_element_type=jnp.float32)
          + o1b_ref[...])
    o1 = jnp.maximum(o1, 0.0)                                      # (H, B)

    # Linear(H -> 1) as broadcast-mul + sublane reduce (VPU/XLU, no MXU).
    logit = jnp.sum(o2w_ref[...] * o1, axis=0, keepdims=True) + o2b_ref[...]
    out_ref[...] = pl.reciprocal(1.0 + jnp.exp(-logit), approx=True)  # Sigmoid


# --------------------------- weight packing ----------------------------------
def _toeplitz_with_bias(conv_w, conv_b):
    """(F, K) conv weight + (F,) bias -> (POOL_SIZE*F*POOL_LEN, SEQ_LEN+1).

    Row (h*F*POOL_LEN + f*POOL_LEN + p) holds filter f placed at conv position
    POOL_SIZE*p + h, so max-pooling is a max over the two row halves and the
    pooled rows land in PyTorch's flatten order (f*POOL_LEN + p).  The last
    column holds the conv bias (matched by a ones row in the input)."""
    num_f, k = conv_w.shape
    start = (POOL_SIZE * jnp.arange(POOL_LEN)[None, :]
             + jnp.arange(POOL_SIZE)[:, None])                    # (PS, PL)
    j = jnp.arange(SEQ_LEN)[None, None, :] - start[:, :, None]    # (PS, PL, S)
    valid = (j >= 0) & (j < k)
    taps = conv_w[:, jnp.clip(j, 0, k - 1)]                       # (F, PS, PL, S)
    toe = jnp.where(valid[None], taps, 0.0)
    toe = jnp.transpose(toe, (1, 0, 2, 3)).reshape(
        POOL_SIZE * num_f * POOL_LEN, SEQ_LEN)
    bias_col = jnp.tile(jnp.repeat(conv_b, POOL_LEN), POOL_SIZE)[:, None]
    return jnp.concatenate([toe, bias_col], axis=1)               # (rows, S+1)


def pack_params(params, mxu_dtype=MXU_DTYPE):
    """One-time host-side repack of torch-layout params into kernel operands."""
    return dict(
        toe_q=_toeplitz_with_bias(params["conv_q_w"],
                                  params["conv_q_b"]).astype(mxu_dtype),
        toe_p=_toeplitz_with_bias(params["conv_p_w"],
                                  params["conv_p_b"]).astype(mxu_dtype),
        fcq_w=params["fc_q_w"].astype(mxu_dtype),          # (H, FLAT)
        fcq_b=params["fc_q_b"].astype(jnp.float32),        # (H, 1)
        fcp_w=params["fc_p_w"].astype(mxu_dtype),
        fcp_b=params["fc_p_b"].astype(jnp.float32),
        o1q_w=params["out1_w"][:, :HIDDEN_SIZE].astype(mxu_dtype),   # (H, H)
        o1p_w=params["out1_w"][:, HIDDEN_SIZE:].astype(mxu_dtype),   # (H, H)
        o1_b=params["out1_b"].astype(jnp.float32),          # (H, 1)
        o2_w=params["out2_w"].T.astype(jnp.float32),        # (H, 1) column
        o2_b=params["out2_b"].astype(jnp.float32),          # (1, 1)
    )


# ------------------------------ wrapper --------------------------------------
def relevancy_forward(packed, x_query, x_passage, lane_tile=LANE_TILE):
    """x_query, x_passage: (B, 100) -> (B, 1) float32 sigmoid scores."""
    B = x_query.shape[0]
    b128 = _round_up(B, 128)
    lt = min(lane_tile, b128)
    if b128 >= 256:
        # Guarantee >= 2 grid steps so v7x megacore can shard the batch axis.
        lt = min(lt, _round_up(-(-b128 // 2), 128))
    b_pad = _round_up(b128, lt)

    def prep(x):
        # Fold transpose + bf16 cast + ones (bias) row + batch zero-pad into
        # one pass; the kernel-side DMA is then lane-dense bf16.
        xT = jnp.asarray(x, jnp.float32).T.astype(MXU_DTYPE)        # (S, B)
        xT = jnp.concatenate(
            [xT, jnp.ones((1, xT.shape[1]), MXU_DTYPE)], axis=0)    # (S+1, B)
        return jnp.pad(xT, ((0, 0), (0, b_pad - B)))                # (S+1, b_pad)

    xq = prep(x_query)
    xp = prep(x_passage)

    weights = (packed["toe_q"], packed["toe_p"],
               packed["fcq_w"], packed["fcq_b"],
               packed["fcp_w"], packed["fcp_b"],
               packed["o1q_w"], packed["o1p_w"], packed["o1_b"],
               packed["o2_w"], packed["o2_b"])

    x_spec = pl.BlockSpec((IN_ROWS, lt), lambda i: (0, i))
    w_specs = [pl.BlockSpec(w.shape, lambda i: (0, 0)) for w in weights]

    flops_per_sample = (2 * 2 * (2 * FLAT_LEN) * IN_ROWS        # two conv matmuls
                        + 2 * 2 * HIDDEN_SIZE * FLAT_LEN        # two branch FCs
                        + 2 * 2 * HIDDEN_SIZE * HIDDEN_SIZE     # split output hidden
                        + 2 * HIDDEN_SIZE)                      # output row
    weight_bytes = sum(int(w.size) * w.dtype.itemsize for w in weights)
    cost = pl.CostEstimate(
        flops=b_pad * flops_per_sample,
        transcendentals=2 * b_pad,                              # exp + rcp per lane
        bytes_accessed=2 * b_pad * IN_ROWS * 2 + 4 * b_pad + weight_bytes)

    out = pl.pallas_call(
        _relevancy_kernel,
        out_shape=jax.ShapeDtypeStruct((1, b_pad), jnp.float32),
        grid=(b_pad // lt,),
        in_specs=[x_spec, x_spec] + w_specs,
        out_specs=pl.BlockSpec((1, lt), lambda i: (0, i)),
        compiler_params=pltpu.CompilerParams(
            dimension_semantics=("parallel",),
            vmem_limit_bytes=48 * 1024 * 1024),
        cost_estimate=cost,
    )(xq, xp, *weights)

    return out[:, :B].T                                          # (B, 1)


# ------------------------- params & reference ---------------------------------
def init_params(key):
    ks = jax.random.split(key, 12)

    def w(k, shape, scale=0.1):
        return (scale * jax.random.normal(k, shape)).astype(jnp.float32)

    return {
        # Conv1d weight is (out_ch, in_ch=1, K) in torch; stored squeezed (F, K)
        "conv_q_w": w(ks[0], (NUM_FILTERS, KERNEL_SIZE)),
        "conv_q_b": w(ks[1], (NUM_FILTERS,)),
        "conv_p_w": w(ks[2], (NUM_FILTERS, KERNEL_SIZE)),
        "conv_p_b": w(ks[3], (NUM_FILTERS,)),
        # Linear weights kept in torch (out, in) layout; biases as columns
        "fc_q_w": w(ks[4], (HIDDEN_SIZE, FLAT_LEN)),
        "fc_q_b": w(ks[5], (HIDDEN_SIZE, 1)),
        "fc_p_w": w(ks[6], (HIDDEN_SIZE, FLAT_LEN)),
        "fc_p_b": w(ks[7], (HIDDEN_SIZE, 1)),
        "out1_w": w(ks[8], (HIDDEN_SIZE, 2 * HIDDEN_SIZE)),
        "out1_b": w(ks[9], (HIDDEN_SIZE, 1)),
        "out2_w": w(ks[10], (1, HIDDEN_SIZE)),
        "out2_b": w(ks[11], (1, 1)),
    }


def reference_forward(params, xq, xp, mxu_dtype=MXU_DTYPE):
    """Pure-JAX replica of the PyTorch forward, emulating the kernel's
    bf16-operand / f32-accumulate matmuls (and bf16-stored conv bias) for an
    apples-to-apples check."""
    cast = lambda a: a.astype(mxu_dtype)

    def conv_branch(x, cw, cb):
        cols = jnp.stack([x[:, j:j + CONV_LEN] for j in range(KERNEL_SIZE)],
                         axis=-1)                                  # (B, L, K)
        conv = jnp.einsum("blk,fk->bfl", cast(cols), cast(cw),
                          preferred_element_type=jnp.float32)
        # kernel folds the conv bias into the bf16 Toeplitz matrix
        conv = conv + cast(cb).astype(jnp.float32)[None, :, None]
        conv = jnp.maximum(conv, 0.0)
        pooled = conv.reshape(x.shape[0], NUM_FILTERS, POOL_LEN, POOL_SIZE).max(-1)
        return pooled.reshape(x.shape[0], FLAT_LEN)

    def linear(x, w, b):
        return jnp.matmul(cast(x), cast(w.T),
                          preferred_element_type=jnp.float32) + b[:, 0]

    hq = jnp.maximum(linear(conv_branch(xq, params["conv_q_w"], params["conv_q_b"]),
                            params["fc_q_w"], params["fc_q_b"]), 0.0)
    hp = linear(conv_branch(xp, params["conv_p_w"], params["conv_p_b"]),
                params["fc_p_w"], params["fc_p_b"])
    cat = jnp.concatenate([hq, hp], axis=1)
    o1 = jnp.maximum(linear(cat, params["out1_w"], params["out1_b"]), 0.0)
    o2 = o1 @ params["out2_w"].T + params["out2_b"][:, 0]
    return jax.nn.sigmoid(o2)


if __name__ == "__main__":
    key = jax.random.PRNGKey(0)
    kp, kq, kx = jax.random.split(key, 3)
    params = init_params(kp)
    packed = pack_params(params)

    # Small deterministic example consistent with the module: batch=2, seq=100.
    B = 2
    x_query = jax.random.normal(kq, (B, SEQ_LEN), jnp.float32)
    x_passage = jax.random.normal(kx, (B, SEQ_LEN), jnp.float32)

    out = jax.block_until_ready(relevancy_forward(packed, x_query, x_passage))
    ref = reference_forward(params, x_query, x_passage)
    assert out.shape == (B, 1), out.shape
    assert jnp.allclose(out, ref, atol=2e-3, rtol=0.0), (out, ref)

    # Exercise the multi-tile grid + batch padding path (>=2 lane tiles).
    B2 = 300
    kq2, kx2 = jax.random.split(jax.random.PRNGKey(1))
    xq2 = jax.random.normal(kq2, (B2, SEQ_LEN), jnp.float32)
    xp2 = jax.random.normal(kx2, (B2, SEQ_LEN), jnp.float32)
    out2 = jax.block_until_ready(relevancy_forward(packed, xq2, xp2))
    ref2 = reference_forward(params, xq2, xp2)
    assert out2.shape == (B2, 1), out2.shape
    assert jnp.allclose(out2, ref2, atol=2e-3, rtol=0.0), float(
        jnp.abs(out2 - ref2).max())

    # Also exercise a small explicit lane tile (3 tiles of 128).
    out3 = jax.block_until_ready(
        relevancy_forward(packed, xq2, xp2, lane_tile=128))
    assert jnp.allclose(out3, ref2, atol=2e-3, rtol=0.0), float(
        jnp.abs(out3 - ref2).max())

    print("KERNEL_OK")
</pallas_src>

<mosaic_0001>
module attributes {stable_mosaic.version = 11 : i64} {
  func.func @_relevancy_kernel(%arg0: i32, %arg1: memref<101x128xbf16, #tpu.memory_space<vmem>>, %arg2: memref<101x128xbf16, #tpu.memory_space<vmem>>, %arg3: memref<384x101xbf16, #tpu.memory_space<vmem>>, %arg4: memref<384x101xbf16, #tpu.memory_space<vmem>>, %arg5: memref<32x192xbf16, #tpu.memory_space<vmem>>, %arg6: memref<32x1xf32, #tpu.memory_space<vmem>>, %arg7: memref<32x192xbf16, #tpu.memory_space<vmem>>, %arg8: memref<32x1xf32, #tpu.memory_space<vmem>>, %arg9: memref<32x32xbf16, #tpu.memory_space<vmem>>, %arg10: memref<32x32xbf16, #tpu.memory_space<vmem>>, %arg11: memref<32x1xf32, #tpu.memory_space<vmem>>, %arg12: memref<32x1xf32, #tpu.memory_space<vmem>>, %arg13: memref<1x1xf32, #tpu.memory_space<vmem>>, %arg14: memref<1x128xf32, #tpu.memory_space<vmem>>) attributes {dimension_semantics = [#tpu.dimension_semantics<parallel>], iteration_bounds = array<i64: 1>, scalar_prefetch = 0 : i64, scratch_operands = 0 : i64, tpu.core_type = #tpu.core_type<tc>, window_params = [{transform_indices = @transform_0, window_bounds = array<i64: 101, 128>}, {transform_indices = @transform_1, window_bounds = array<i64: 101, 128>}, {pipeline_mode = #tpu.pipeline_mode<synchronous>, transform_indices = @transform_2, window_bounds = array<i64: 384, 101>}, {pipeline_mode = #tpu.pipeline_mode<synchronous>, transform_indices = @transform_3, window_bounds = array<i64: 384, 101>}, {pipeline_mode = #tpu.pipeline_mode<synchronous>, transform_indices = @transform_4, window_bounds = array<i64: 32, 192>}, {pipeline_mode = #tpu.pipeline_mode<synchronous>, transform_indices = @transform_5, window_bounds = array<i64: 32, 1>}, {pipeline_mode = #tpu.pipeline_mode<synchronous>, transform_indices = @transform_6, window_bounds = array<i64: 32, 192>}, {pipeline_mode = #tpu.pipeline_mode<synchronous>, transform_indices = @transform_7, window_bounds = array<i64: 32, 1>}, {pipeline_mode = #tpu.pipeline_mode<synchronous>, transform_indices = @transform_8, window_bounds = array<i64: 32, 32>}, {pipeline_mode = #tpu.pipeline_mode<synchronous>, transform_indices = @transform_9, window_bounds = array<i64: 32, 32>}, {pipeline_mode = #tpu.pipeline_mode<synchronous>, transform_indices = @transform_10, window_bounds = array<i64: 32, 1>}, {pipeline_mode = #tpu.pipeline_mode<synchronous>, transform_indices = @transform_11, window_bounds = array<i64: 32, 1>}, {pipeline_mode = #tpu.pipeline_mode<synchronous>, transform_indices = @transform_12, window_bounds = array<i64: 1, 1>}, {transform_indices = @transform_13, window_bounds = array<i64: 1, 128>}]} {
    %c0 = arith.constant 0 : index
    %c0_0 = arith.constant 0 : index
    %0 = vector.load %arg3[%c0, %c0_0] : memref<384x101xbf16, #tpu.memory_space<vmem>>, vector<384x101xbf16>
    %c0_1 = arith.constant 0 : index
    %c0_2 = arith.constant 0 : index
    %1 = vector.load %arg1[%c0_1, %c0_2] : memref<101x128xbf16, #tpu.memory_space<vmem>>, vector<101x128xbf16>
    %cst = arith.constant dense<0.000000e+00> : vector<384x128xf32>
    %2 = tpu.matmul %0, %1, %cst {dimension_numbers = #tpu.dot_dimension_numbers<[1], [0], [0], [1], [0, 0, 1, 1], [], []>} : vector<384x101xbf16>, vector<101x128xbf16>, vector<384x128xf32> -> vector<384x128xf32>
    %cst_3 = arith.constant 0.000000e+00 : f32
    %3 = vector.broadcast %cst_3 : f32 to vector<384x128xf32>
    %4 = arith.maximumf %2, %3 : vector<384x128xf32>
    %5 = vector.extract_strided_slice %4 {offsets = [0, 0], sizes = [192, 128], strides = [1, 1]} : vector<384x128xf32> to vector<192x128xf32>
    %6 = vector.extract_strided_slice %4 {offsets = [192, 0], sizes = [192, 128], strides = [1, 1]} : vector<384x128xf32> to vector<192x128xf32>
    %7 = arith.maximumf %5, %6 : vector<192x128xf32>
    %8 = arith.truncf %7 : vector<192x128xf32> to vector<192x128xbf16>
    %c0_4 = arith.constant 0 : index
    %c0_5 = arith.constant 0 : index
    %9 = vector.load %arg4[%c0_4, %c0_5] : memref<384x101xbf16, #tpu.memory_space<vmem>>, vector<384x101xbf16>
    %c0_6 = arith.constant 0 : index
    %c0_7 = arith.constant 0 : index
    %10 = vector.load %arg2[%c0_6, %c0_7] : memref<101x128xbf16, #tpu.memory_space<vmem>>, vector<101x128xbf16>
    %cst_8 = arith.constant dense<0.000000e+00> : vector<384x128xf32>
    %11 = tpu.matmul %9, %10, %cst_8 {dimension_numbers = #tpu.dot_dimension_numbers<[1], [0], [0], [1], [0, 0, 1, 1], [], []>} : vector<384x101xbf16>, vector<101x128xbf16>, vector<384x128xf32> -> vector<384x128xf32>
    %cst_9 = arith.constant 0.000000e+00 : f32
    %12 = vector.broadcast %cst_9 : f32 to vector<384x128xf32>
    %13 = arith.maximumf %11, %12 : vector<384x128xf32>
    %14 = vector.extract_strided_slice %13 {offsets = [0, 0], sizes = [192, 128], strides = [1, 1]} : vector<384x128xf32> to vector<192x128xf32>
    %15 = vector.extract_strided_slice %13 {offsets = [192, 0], sizes = [192, 128], strides = [1, 1]} : vector<384x128xf32> to vector<192x128xf32>
    %16 = arith.maximumf %14, %15 : vector<192x128xf32>
    %17 = arith.truncf %16 : vector<192x128xf32> to vector<192x128xbf16>
    %c0_10 = arith.constant 0 : index
    %c0_11 = arith.constant 0 : index
    %18 = vector.load %arg5[%c0_10, %c0_11] : memref<32x192xbf16, #tpu.memory_space<vmem>>, vector<32x192xbf16>
    %cst_12 = arith.constant dense<0.000000e+00> : vector<32x128xf32>
    %19 = tpu.matmul %18, %8, %cst_12 {dimension_numbers = #tpu.dot_dimension_numbers<[1], [0], [0], [1], [0, 0, 1, 1], [], []>} : vector<32x192xbf16>, vector<192x128xbf16>, vector<32x128xf32> -> vector<32x128xf32>
    %c0_13 = arith.constant 0 : index
    %c0_14 = arith.constant 0 : index
    %20 = vector.load %arg6[%c0_13, %c0_14] : memref<32x1xf32, #tpu.memory_space<vmem>>, vector<32x1xf32>
    %21 = vector.broadcast %20 : vector<32x1xf32> to vector<32x128xf32>
    %22 = arith.addf %19, %21 : vector<32x128xf32>
    %cst_15 = arith.constant 0.000000e+00 : f32
    %23 = vector.broadcast %cst_15 : f32 to vector<32x128xf32>
    %24 = arith.maximumf %22, %23 : vector<32x128xf32>
    %25 = arith.truncf %24 : vector<32x128xf32> to vector<32x128xbf16>
    %c0_16 = arith.constant 0 : index
    %c0_17 = arith.constant 0 : index
    %26 = vector.load %arg7[%c0_16, %c0_17] : memref<32x192xbf16, #tpu.memory_space<vmem>>, vector<32x192xbf16>
    %cst_18 = arith.constant dense<0.000000e+00> : vector<32x128xf32>
    %27 = tpu.matmul %26, %17, %cst_18 {dimension_numbers = #tpu.dot_dimension_numbers<[1], [0], [0], [1], [0, 0, 1, 1], [], []>} : vector<32x192xbf16>, vector<192x128xbf16>, vector<32x128xf32> -> vector<32x128xf32>
    %c0_19 = arith.constant 0 : index
    %c0_20 = arith.constant 0 : index
    %28 = vector.load %arg8[%c0_19, %c0_20] : memref<32x1xf32, #tpu.memory_space<vmem>>, vector<32x1xf32>
    %29 = vector.broadcast %28 : vector<32x1xf32> to vector<32x128xf32>
    %30 = arith.addf %27, %29 : vector<32x128xf32>
    %31 = arith.truncf %30 : vector<32x128xf32> to vector<32x128xbf16>
    %c0_21 = arith.constant 0 : index
    %c0_22 = arith.constant 0 : index
    %32 = vector.load %arg9[%c0_21, %c0_22] : memref<32x32xbf16, #tpu.memory_space<vmem>>, vector<32x32xbf16>
    %cst_23 = arith.constant dense<0.000000e+00> : vector<32x128xf32>
    %33 = tpu.matmul %32, %25, %cst_23 {dimension_numbers = #tpu.dot_dimension_numbers<[1], [0], [0], [1], [0, 0, 1, 1], [], []>} : vector<32x32xbf16>, vector<32x128xbf16>, vector<32x128xf32> -> vector<32x128xf32>
    %c0_24 = arith.constant 0 : index
    %c0_25 = arith.constant 0 : index
    %34 = vector.load %arg10[%c0_24, %c0_25] : memref<32x32xbf16, #tpu.memory_space<vmem>>, vector<32x32xbf16>
    %cst_26 = arith.constant dense<0.000000e+00> : vector<32x128xf32>
    %35 = tpu.matmul %34, %31, %cst_26 {dimension_numbers = #tpu.dot_dimension_numbers<[1], [0], [0], [1], [0, 0, 1, 1], [], []>} : vector<32x32xbf16>, vector<32x128xbf16>, vector<32x128xf32> -> vector<32x128xf32>
    %36 = arith.addf %33, %35 : vector<32x128xf32>
    %c0_27 = arith.constant 0 : index
    %c0_28 = arith.constant 0 : index
    %37 = vector.load %arg11[%c0_27, %c0_28] : memref<32x1xf32, #tpu.memory_space<vmem>>, vector<32x1xf32>
    %38 = vector.broadcast %37 : vector<32x1xf32> to vector<32x128xf32>
    %39 = arith.addf %36, %38 : vector<32x128xf32>
    %cst_29 = arith.constant 0.000000e+00 : f32
    %40 = vector.broadcast %cst_29 : f32 to vector<32x128xf32>
    %41 = arith.maximumf %39, %40 : vector<32x128xf32>
    %c0_30 = arith.constant 0 : index
    %c0_31 = arith.constant 0 : index
    %42 = vector.load %arg12[%c0_30, %c0_31] : memref<32x1xf32, #tpu.memory_space<vmem>>, vector<32x1xf32>
    %43 = vector.broadcast %42 : vector<32x1xf32> to vector<32x128xf32>
    %44 = arith.mulf %43, %41 : vector<32x128xf32>
    %cst_32 = arith.constant dense<0.000000e+00> : vector<128xf32>
    %45 = vector.multi_reduction <add>, %44, %cst_32 [0] : vector<32x128xf32> to vector<128xf32>
    %46 = vector.shape_cast %45 : vector<128xf32> to vector<1x128xf32>
    %c0_33 = arith.constant 0 : index
    %c0_34 = arith.constant 0 : index
    %47 = vector.load %arg13[%c0_33, %c0_34] : memref<1x1xf32, #tpu.memory_space<vmem>>, vector<1x1xf32>
    %48 = vector.broadcast %47 : vector<1x1xf32> to vector<1x128xf32>
    %49 = arith.addf %46, %48 : vector<1x128xf32>
    %cst_35 = arith.constant 0.000000e+00 : f32
    %50 = vector.broadcast %cst_35 : f32 to vector<1x128xf32>
    %51 = arith.subf %50, %49 : vector<1x128xf32>
    %52 = math.exp %51 : vector<1x128xf32>
    %cst_36 = arith.constant 1.000000e+00 : f32
    %53 = vector.broadcast %cst_36 : f32 to vector<1x128xf32>
    %54 = arith.addf %53, %52 : vector<1x128xf32>
    %55 = tpu.reciprocal %54 {approx = true} : vector<1x128xf32> -> vector<1x128xf32>
    %c0_37 = arith.constant 0 : index
    %c0_38 = arith.constant 0 : index
    %56 = vector.load %arg14[%c0_37, %c0_38] : memref<1x128xf32, #tpu.memory_space<vmem>>, vector<1x128xf32>
    tpu.vector_store %arg14[%c0_37, %c0_38], %55 {strides = array<i32>} : memref<1x128xf32, #tpu.memory_space<vmem>>, vector<1x128xf32>,
    return
  }
  func.func @transform_0(%arg0: i32) -> (i32, i32) {
    %c0_i32 = arith.constant 0 : i32
    %c0_i32_0 = arith.constant 0 : i32
    return %c0_i32, %arg0 : i32, i32
  }
  func.func @transform_1(%arg0: i32) -> (i32, i32) {
    %c0_i32 = arith.constant 0 : i32
    %c0_i32_0 = arith.constant 0 : i32
    return %c0_i32, %arg0 : i32, i32
  }
  func.func @transform_2(%arg0: i32) -> (i32, i32) {
    %c0_i32 = arith.constant 0 : i32
    %c0_i32_0 = arith.constant 0 : i32
    %c0_i32_1 = arith.constant 0 : i32
    return %c0_i32, %c0_i32_0 : i32, i32
  }
  func.func @transform_3(%arg0: i32) -> (i32, i32) {
    %c0_i32 = arith.constant 0 : i32
    %c0_i32_0 = arith.constant 0 : i32
    %c0_i32_1 = arith.constant 0 : i32
    return %c0_i32, %c0_i32_0 : i32, i32
  }
  func.func @transform_4(%arg0: i32) -> (i32, i32) {
    %c0_i32 = arith.constant 0 : i32
    %c0_i32_0 = arith.constant 0 : i32
    %c0_i32_1 = arith.constant 0 : i32
    return %c0_i32, %c0_i32_0 : i32, i32
  }
  func.func @transform_5(%arg0: i32) -> (i32, i32) {
    %c0_i32 = arith.constant 0 : i32
    %c0_i32_0 = arith.constant 0 : i32
    %c0_i32_1 = arith.constant 0 : i32
    return %c0_i32, %c0_i32_0 : i32, i32
  }
  func.func @transform_6(%arg0: i32) -> (i32, i32) {
    %c0_i32 = arith.constant 0 : i32
    %c0_i32_0 = arith.constant 0 : i32
    %c0_i32_1 = arith.constant 0 : i32
    return %c0_i32, %c0_i32_0 : i32, i32
  }
  func.func @transform_7(%arg0: i32) -> (i32, i32) {
    %c0_i32 = arith.constant 0 : i32
    %c0_i32_0 = arith.constant 0 : i32
    %c0_i32_1 = arith.constant 0 : i32
    return %c0_i32, %c0_i32_0 : i32, i32
  }
  func.func @transform_8(%arg0: i32) -> (i32, i32) {
    %c0_i32 = arith.constant 0 : i32
    %c0_i32_0 = arith.constant 0 : i32
    %c0_i32_1 = arith.constant 0 : i32
    return %c0_i32, %c0_i32_0 : i32, i32
  }
  func.func @transform_9(%arg0: i32) -> (i32, i32) {
    %c0_i32 = arith.constant 0 : i32
    %c0_i32_0 = arith.constant 0 : i32
    %c0_i32_1 = arith.constant 0 : i32
    return %c0_i32, %c0_i32_0 : i32, i32
  }
  func.func @transform_10(%arg0: i32) -> (i32, i32) {
    %c0_i32 = arith.constant 0 : i32
    %c0_i32_0 = arith.constant 0 : i32
    %c0_i32_1 = arith.constant 0 : i32
    return %c0_i32, %c0_i32_0 : i32, i32
  }
  func.func @transform_11(%arg0: i32) -> (i32, i32) {
    %c0_i32 = arith.constant 0 : i32
    %c0_i32_0 = arith.constant 0 : i32
    %c0_i32_1 = arith.constant 0 : i32
    return %c0_i32, %c0_i32_0 : i32, i32
  }
  func.func @transform_12(%arg0: i32) -> (i32, i32) {
    %c0_i32 = arith.constant 0 : i32
    %c0_i32_0 = arith.constant 0 : i32
    %c0_i32_1 = arith.constant 0 : i32
    return %c0_i32, %c0_i32_0 : i32, i32
  }
  func.func @transform_13(%arg0: i32) -> (i32, i32) {
    %c0_i32 = arith.constant 0 : i32
    %c0_i32_0 = arith.constant 0 : i32
    return %c0_i32, %arg0 : i32, i32
  }
}

</mosaic_0001>

<bundles_post_ra>
// kernel: tpu_custom_call.1
= control target key start
LH: loop header
LB: loop body
LE: loop exit
PB: predicated region body
PF: predicated region fallthrough
CT: control target
= control target key end

     0   :  { %s2762_s0 = inlined_call_operand.vmem [shape: bf16[101,128], index: 0, kind: input, shape index: {}]   ;;  %s2763_s1 = inlined_call_operand.vmem [shape: bf16[101,128], index: 1, kind: input, shape index: {}]   ;;  %s2764_s2 = inlined_call_operand.vmem [shape: bf16[384,101], index: 2, kind: input, shape index: {}]   ;;  %s2765_s3 = inlined_call_operand.vmem [shape: bf16[384,101], index: 3, kind: input, shape index: {}]   ;;  %s2766_s4 = inlined_call_operand.vmem [shape: bf16[32,192], index: 4, kind: input, shape index: {}]   ;;  %s2767_s5 = inlined_call_operand.vmem [shape: f32[32,1], index: 5, kind: input, shape index: {}]   ;;  %s2768_s6 = inlined_call_operand.vmem [shape: bf16[32,192], index: 6, kind: input, shape index: {}]   ;;  %s2769_s7 = inlined_call_operand.vmem [shape: f32[32,1], index: 7, kind: input, shape index: {}]   ;;  %s2770_s8 = inlined_call_operand.vmem [shape: bf16[32,32], index: 8, kind: input, shape index: {}]   ;;  %s2771_s9 = inlined_call_operand.vmem [shape: bf16[32,32], index: 9, kind: input, shape index: {}]   ;;  %s2772_s10 = inlined_call_operand.vmem [shape: f32[32,1], index: 10, kind: input, shape index: {}]   ;;  %s2773_s11 = inlined_call_operand.vmem [shape: f32[32,1], index: 11, kind: input, shape index: {}]   ;;  %s2774_s12 = inlined_call_operand.<no memory space> [shape: f32[1,1], index: 12, kind: input, shape index: {}]   ;;  %s2775_s13 = inlined_call_operand.hbm [shape: f32[1,128], index: 13, kind: output, shape index: {}]  }
   0x1   :  { %v18_v0 = vstv %s2774_s12 }
   0x2   :  { %19 = vst [vmem:[#allocation2] sm:$0x1] %v18_v0 }
   0x3   :  { %v2060_v1 = vld [vmem:[%s2762_s0] sm:$0xff]   ;;  %v2062_v3 = vld [vmem:[%s2762_s0 + $0x8] sm:$0xff]   ;;  %v2064_v5 = vld [vmem:[%s2762_s0 + $0x10] sm:$0xff]   ;;  %vm341_vm0 = vcmask 1041408   ;;  %vm268_vm1 = vcmask 826368   ;;  %vm342_vm2 = vcmask 1042432  }
   0x4   :  { %v2061_v2 = vld [vmem:[%s2763_s1] sm:$0xff]   ;;  %1911 = vmatprep.subr.bf16.mxu0 %v2060_v1  ;;  %v2063_v4 = vld [vmem:[%s2763_s1 + $0x8] sm:$0xff]   ;;  %v2065_v6 = vld [vmem:[%s2763_s1 + $0x10] sm:$0xff]   ;;  %v2166_v12 = vmov 65535  }
   0x5   :  { %1973 = vmatprep.subr.bf16.mxu1 %v2061_v2  ;;  %1912 = vmatpush3.bf16.msra.mxu0 %v2060_v1  ;;  %v2066_v7 = vld [vmem:[%s2762_s0 + $0x18] sm:$0xff]   ;;  %v2068_v9 = vld [vmem:[%s2762_s0 + $0x20] sm:$0xff]   ;;  %v343_v13 = vsel %vm341_vm0, 4294967295, %v2166_v12  ;;  %v2072_v15 = vld [vmem:[%s2762_s0 + $0x30] ss:$0 sps:$4 sm:$0x77]  }
   0x6   :  { %1974 = vmatpush3.bf16.msra.mxu1 %v2061_v2  ;;  %1913 = vmatprep.subr.bf16.mxu0 %v2062_v3  ;;  %v2067_v8 = vld [vmem:[%s2763_s1 + $0x18] sm:$0xff]   ;;  %v2074_v10 = vld [vmem:[%s2764_s2] sm:$0xff]   ;;  %v2073_v16 = vld [vmem:[%s2763_s1 + $0x30] ss:$0 sps:$4 sm:$0x77]   ;;  %v344_v19 = vsel %vm342_vm2, %v343_v13, 0 }
   0x7   :  { %1975 = vmatprep.subr.bf16.mxu1 %v2063_v4  ;;  %v2069_v11 = vld [vmem:[%s2763_s1 + $0x20] sm:$0xff]   ;;  %1925 = vmatprep.mubr.msk.bf16.mxu0 %vm268_vm1, %v2074_v10  ;;  %v2070_v17 = vld [vmem:[%s2762_s0 + $0x28] sm:$0xff]   ;;  %v346_v20 = vand.u32 %v2072_v15, %v344_v19  ;;  %v950_v21 = vand.u32 %v2073_v16, %v344_v19  ;;  %v2078_v24 = vld [vmem:[%s2764_s2 + $0x10] sm:$0xff]  }
   0x8   :  { %v2075_v14 = vld [vmem:[%s2765_s3] sm:$0xff]   ;;  %v2071_v18 = vld [vmem:[%s2763_s1 + $0x28] sm:$0xff]   ;;  %v2079_v25 = vld [vmem:[%s2765_s3 + $0x10] sm:$0xff]  }
   0x9   :  { %1914 = vmatpush3.bf16.msra.mxu0 %v2062_v3  ;;  %1987 = vmatprep.mubr.msk.bf16.mxu1 %vm268_vm1, %v2075_v14  ;;  %v2076_v22 = vld [vmem:[%s2764_s2 + $0x8] sm:$0xff]   ;;  %v2080_v26 = vld [vmem:[%s2764_s2 + $0x18] sm:$0xff]   ;;  %v2082_v28 = vld [vmem:[%s2764_s2 + $0x20] sm:$0xff]  }
   0xa   :  { %1976 = vmatpush3.bf16.msra.mxu1 %v2063_v4  ;;  %1915 = vmatprep.subr.bf16.mxu0 %v2064_v5  ;;  %v2077_v23 = vld [vmem:[%s2765_s3 + $0x8] sm:$0xff]   ;;  %v2081_v27 = vld [vmem:[%s2765_s3 + $0x18] sm:$0xff]   ;;  %v2083_v29 = vld [vmem:[%s2765_s3 + $0x20] sm:$0xff]  }
   0xb   :  { %1977 = vmatprep.subr.bf16.mxu1 %v2065_v6  ;;  %v2084_v30 = vld [vmem:[%s2764_s2 + $0x28] sm:$0xff]   ;;  %v2086_v32 = vld [vmem:[%s2764_s2 + $0x30] sm:$0xff]   ;;  %v2088_v34 = vld [vmem:[%s2764_s2 + $0x38] sm:$0xff]  }
   0xc   :  { %v2085_v31 = vld [vmem:[%s2765_s3 + $0x28] sm:$0xff]   ;;  %v2087_v33 = vld [vmem:[%s2765_s3 + $0x30] sm:$0xff]   ;;  %v2089_v35 = vld [vmem:[%s2765_s3 + $0x38] sm:$0xff]  }
   0xd   :  { %1916 = vmatpush3.bf16.msra.mxu0 %v2064_v5  ;;  %v2090_v36 = vld [vmem:[%s2764_s2 + $0x40] sm:$0xff]   ;;  %v2092_v38 = vld [vmem:[%s2764_s2 + $0x48] sm:$0xff]   ;;  %v2094_v40 = vld [vmem:[%s2764_s2 + $0x50] sm:$0xff]  }
   0xe   :  { %1978 = vmatpush3.bf16.msra.mxu1 %v2065_v6  ;;  %1917 = vmatprep.subr.bf16.mxu0 %v2066_v7  ;;  %v2091_v37 = vld [vmem:[%s2765_s3 + $0x40] sm:$0xff]   ;;  %v2093_v39 = vld [vmem:[%s2765_s3 + $0x48] sm:$0xff]   ;;  %v2095_v41 = vld [vmem:[%s2765_s3 + $0x50] sm:$0xff]  }
   0xf   :  { %1979 = vmatprep.subr.bf16.mxu1 %v2067_v8  ;;  %v2096_v42 = vld [vmem:[%s2764_s2 + $0x58] sm:$0xff]  }
  0x11   :  { %1918 = vmatpush3.bf16.msra.mxu0 %v2066_v7 }
  0x12   :  { %1980 = vmatpush3.bf16.msra.mxu1 %v2067_v8  ;;  %1919 = vmatprep.subr.bf16.mxu0 %v2068_v9 }
  0x13   :  { %1981 = vmatprep.subr.bf16.mxu1 %v2069_v11 }
  0x15   :  { %1920 = vmatpush3.bf16.msra.mxu0 %v2068_v9 }
  0x16   :  { %1982 = vmatpush3.bf16.msra.mxu1 %v2069_v11  ;;  %1921 = vmatprep.subr.bf16.mxu0 %v2070_v17 }
  0x17   :  { %1983 = vmatprep.subr.bf16.mxu1 %v2071_v18 }
  0x19   :  { %1922 = vmatpush3.bf16.msra.mxu0 %v2070_v17 }
  0x1a   :  { %1984 = vmatpush3.bf16.msra.mxu1 %v2071_v18  ;;  %1923 = vmatprep.subr.bf16.mxu0 %v346_v20 }
  0x1b   :  { %1985 = vmatprep.subr.bf16.mxu1 %v950_v21 }
  0x1d   :  { %1924 = vmatpush3.bf16.msra.mxu0 %v346_v20 }
  0x1e   :  { %1986 = vmatpush3.bf16.msra.mxu1 %v950_v21 }
  0x20   :  { %1926 = vmatmul.mubr.msk.bf16.vlgmr.msra.gmra.mrb[0].mxu0 %vm268_vm1, %v2076_v22 }
  0x21   :  { %1988 = vmatmul.mubr.msk.bf16.vlgmr.msra.gmra.mrb[0].mxu1 %vm268_vm1, %v2077_v23  ;;  %1929 = vmatprep.mubr.msk.bf16.mxu0 %vm268_vm1, %v2078_v24 }
  0x22   :  { %1991 = vmatprep.mubr.msk.bf16.mxu1 %vm268_vm1, %v2079_v25 }
  0x28   :  { %1930 = vmatmul.mubr.msk.bf16.gmra.mrb[4].mxu0 %vm268_vm1, %v2080_v26 }
  0x29   :  { %1992 = vmatmul.mubr.msk.bf16.gmra.mrb[4].mxu1 %vm268_vm1, %v2081_v27  ;;  %1933 = vmatprep.mubr.msk.bf16.mxu0 %vm268_vm1, %v2082_v28 }
  0x2a   :  { %1995 = vmatprep.mubr.msk.bf16.mxu1 %vm268_vm1, %v2083_v29 }
  0x30   :  { %1934 = vmatmul.mubr.msk.bf16.gmra.mrb[8].mxu0 %vm268_vm1, %v2084_v30 }
  0x31   :  { %1996 = vmatmul.mubr.msk.bf16.gmra.mrb[8].mxu1 %vm268_vm1, %v2085_v31  ;;  %1937 = vmatprep.mubr.msk.bf16.mxu0 %vm268_vm1, %v2086_v32 }
  0x32   :  { %1999 = vmatprep.mubr.msk.bf16.mxu1 %vm268_vm1, %v2087_v33 }
  0x38   :  { %1938 = vmatmul.mubr.msk.bf16.gmra.mrb[12].mxu0 %vm268_vm1, %v2088_v34 }
  0x39   :  { %2000 = vmatmul.mubr.msk.bf16.gmra.mrb[12].mxu1 %vm268_vm1, %v2089_v35  ;;  %1941 = vmatprep.mubr.msk.bf16.mxu0 %vm268_vm1, %v2090_v36 }
  0x3a   :  { %2003 = vmatprep.mubr.msk.bf16.mxu1 %vm268_vm1, %v2091_v37 }
  0x40   :  { %1942 = vmatmul.mubr.msk.bf16.gmra.mrb[16].mxu0 %vm268_vm1, %v2092_v38 }
  0x41   :  { %2004 = vmatmul.mubr.msk.bf16.gmra.mrb[16].mxu1 %vm268_vm1, %v2093_v39  ;;  %1945 = vmatprep.mubr.msk.bf16.mxu0 %vm268_vm1, %v2094_v40 }
  0x42   :  { %2007 = vmatprep.mubr.msk.bf16.mxu1 %vm268_vm1, %v2095_v41 }
  0x43   :  { %20 = vsyncpa [#allocation4], 0  ;;  %v2097_v43 = vld [vmem:[%s2765_s3 + $0x58] sm:$0xff]   ;;  %v2098_v44 = vld [vmem:[%s2764_s2 + $0x60] sm:$0xff]   ;;  %v2776_v4 = vmov 0   ;;  %vm1307_vm3 = vcmask 523264  }
  0x44   :  { %v2099_v45 = vld [vmem:[%s2765_s3 + $0x60] sm:$0xff]   ;;  %v2100_v46 = vld [vmem:[%s2764_s2 + $0x68] sm:$0xff]   ;;  %v2102_v48 = vld [vmem:[%s2764_s2 + $0x70] sm:$0xff]   ;;  %1314 = vmatprep.subr.bf16.mxu0 %v2776_v4  ;;  %1421 = vmatprep.subr.bf16.mxu1 %v2776_v4  ;;  %vm1490_vm4 = vcmask 261120  }
  0x45   :  { %v2101_v47 = vld [vmem:[%s2765_s3 + $0x68] sm:$0xff]   ;;  %v2103_v49 = vld [vmem:[%s2765_s3 + $0x70] sm:$0xff]   ;;  %v2104_v50 = vld [vmem:[%s2764_s2 + $0x78] sm:$0xff]   ;;  %2059 = vset.pattern.permute.xlu1 %v2776_v4  ;;  %2058 = vset.pattern.permute.xlu0 %v2776_v4 }
  0x46   :  { %v2105_v51 = vld [vmem:[%s2765_s3 + $0x78] sm:$0xff]   ;;  %v2106_v52 = vld [vmem:[%s2764_s2 + $0x80] sm:$0xff]   ;;  %v2108_v54 = vld [vmem:[%s2764_s2 + $0x88] sm:$0xff]  }
  0x47   :  { %v2107_v53 = vld [vmem:[%s2765_s3 + $0x80] sm:$0xff]   ;;  %v2109_v55 = vld [vmem:[%s2765_s3 + $0x88] sm:$0xff]   ;;  %v2110_v56 = vld [vmem:[%s2764_s2 + $0x90] sm:$0xff]  }
  0x48   :  { %1946 = vmatmul.mubr.msk.bf16.gmra.mrb[20].mxu0 %vm268_vm1, %v2096_v42  ;;  %v2111_v57 = vld [vmem:[%s2765_s3 + $0x90] sm:$0xff]   ;;  %v2112_v58 = vld [vmem:[%s2764_s2 + $0x98] sm:$0xff]   ;;  %v2114_v60 = vld [vmem:[%s2764_s2 + $0xa0] sm:$0xff]  }
  0x49   :  { %2008 = vmatmul.mubr.msk.bf16.gmra.mrb[20].mxu1 %vm268_vm1, %v2097_v43  ;;  %1949 = vmatprep.mubr.msk.bf16.mxu0 %vm268_vm1, %v2098_v44  ;;  %v2113_v59 = vld [vmem:[%s2765_s3 + $0x98] sm:$0xff]   ;;  %v2115_v61 = vld [vmem:[%s2765_s3 + $0xa0] sm:$0xff]   ;;  %v2116_v62 = vld [vmem:[%s2764_s2 + $0xa8] sm:$0xff]  }
  0x4a   :  { %2011 = vmatprep.mubr.msk.bf16.mxu1 %vm268_vm1, %v2099_v45  ;;  %v2117_v63 = vld [vmem:[%s2765_s3 + $0xa8] sm:$0xff]   ;;  %v2118_v0 = vld [vmem:[%s2764_s2 + $0xb0] sm:$0xff]   ;;  %v2120_v2 = vld [vmem:[%s2764_s2 + $0xb8] sm:$0xff]  }
  0x4b   :  { %v2119_v1 = vld [vmem:[%s2765_s3 + $0xb0] sm:$0xff]   ;;  %v2121_v3 = vld [vmem:[%s2765_s3 + $0xb8] sm:$0xff]   ;;  %v2124_v5 = vld [vmem:[%s2766_s4 + $0x4] ss:$8 sps:$4 sm:$0xff]  }
  0x4c   :  { %v2127_v6 = vld [vmem:[%s2768_s6 + $0x4] ss:$8 sps:$4 sm:$0xff]   ;;  %v1268_v11 = vld [vmem:[%s2767_s5 + $0x18] sm:$0xff]  ;;  %v1267_v12 = vld [vmem:[%s2767_s5 + $0x10] sm:$0xff] }
  0x4d   :  { %v1373_v7 = vld [vmem:[%s2769_s7] sm:$0xff]  ;;  %v1374_v9 = vld [vmem:[%s2769_s7 + $0x8] sm:$0xff]  ;;  %v1376_v13 = vld [vmem:[%s2769_s7 + $0x18] sm:$0xff] }
  0x4e   :  { %v1265_v8 = vld [vmem:[%s2767_s5] sm:$0xff]  ;;  %1379 = vperm.xlu1 %2059, %v1373_v7   ;;  %v1266_v10 = vld [vmem:[%s2767_s5 + $0x8] sm:$0xff]  ;;  %v1375_v14 = vld [vmem:[%s2769_s7 + $0x10] sm:$0xff] }
  0x4f   :  { %1271 = vperm.xlu0 %2058, %v1265_v8   ;;  %v1611_v16 = vld [vmem:[%s2772_s10] sm:$0xff]  ;;  %v1612_v17 = vld [vmem:[%s2772_s10 + $0x8] sm:$0xff]  ;;  %v1613_v25 = vld [vmem:[%s2772_s10 + $0x10] sm:$0xff] }
  0x50   :  { %1950 = vmatmul.mubr.msk.bf16.gmra.mrb[24].mxu0 %vm268_vm1, %v2100_v46  ;;  %v1614_v26 = vld [vmem:[%s2772_s10 + $0x18] sm:$0xff]  ;;  %v1643_v28 = vld [vmem:[%s2773_s11] sm:$0xff]  ;;  %v1644_v29 = vld [vmem:[%s2773_s11 + $0x8] sm:$0xff] }
  0x51   :  { %2012 = vmatmul.mubr.msk.bf16.gmra.mrb[24].mxu1 %vm268_vm1, %v2101_v47  ;;  %1953 = vmatprep.mubr.msk.bf16.mxu0 %vm268_vm1, %v2102_v48  ;;  %v1645_v37 = vld [vmem:[%s2773_s11 + $0x10] sm:$0xff]  ;;  %v1646_v38 = vld [vmem:[%s2773_s11 + $0x18] sm:$0xff]  ;;  %v1680_v40 = vld [vmem:[#allocation2] sm:$0x1] }
  0x52   :  { %2015 = vmatprep.mubr.msk.bf16.mxu1 %vm268_vm1, %v2103_v49  ;;  %1384 = vperm.xlu1 %2059, %v1374_v9  }
  0x53   :  { %1276 = vperm.xlu0 %2058, %v1266_v10  }
  0x56   :  { %1286 = vperm.xlu1 %2059, %v1268_v11  }
  0x57   :  { %1281 = vperm.xlu0 %2058, %v1267_v12  }
  0x58   :  { %1954 = vmatmul.mubr.msk.bf16.gmra.mrb[28].mxu0 %vm268_vm1, %v2104_v50 }
  0x59   :  { %2016 = vmatmul.mubr.msk.bf16.gmra.mrb[28].mxu1 %vm268_vm1, %v2105_v51  ;;  %1957 = vmatprep.mubr.msk.bf16.mxu0 %vm268_vm1, %v2106_v52 }
  0x5a   :  { %2019 = vmatprep.mubr.msk.bf16.mxu1 %vm268_vm1, %v2107_v53  ;;  %1394 = vperm.xlu1 %2059, %v1376_v13  }
  0x5b   :  { %1389 = vperm.xlu0 %2058, %v1375_v14  }
  0x5e   :  { %1622 = vperm.xlu1 %2059, %v1612_v17  }
  0x5f   :  { %1617 = vperm.xlu0 %2058, %v1611_v16  }
  0x60   :  { %1958 = vmatmul.mubr.msk.bf16.gmra.mrb[32].mxu0 %vm268_vm1, %v2108_v54 }
  0x61   :  { %2020 = vmatmul.mubr.msk.bf16.gmra.mrb[32].mxu1 %vm268_vm1, %v2109_v55  ;;  %1961 = vmatprep.mubr.msk.bf16.mxu0 %vm268_vm1, %v2110_v56 }
  0x62   :  { %2023 = vmatprep.mubr.msk.bf16.mxu1 %vm268_vm1, %v2111_v57  ;;  %1632 = vperm.xlu1 %2059, %v1614_v26  }
  0x63   :  { %1627 = vperm.xlu0 %2058, %v1613_v25  }
  0x66   :  { %1654 = vperm.xlu1 %2059, %v1644_v29  }
  0x67   :  { %1649 = vperm.xlu0 %2058, %v1643_v28  }
  0x68   :  { %1962 = vmatmul.mubr.msk.bf16.gmra.mrb[36].mxu0 %vm268_vm1, %v2112_v58 }
  0x69   :  { %2024 = vmatmul.mubr.msk.bf16.gmra.mrb[36].mxu1 %vm268_vm1, %v2113_v59  ;;  %1965 = vmatprep.mubr.msk.bf16.mxu0 %vm268_vm1, %v2114_v60 }
  0x6a   :  { %2027 = vmatprep.mubr.msk.bf16.mxu1 %vm268_vm1, %v2115_v61  ;;  %1664 = vperm.xlu1 %2059, %v1646_v38  }
  0x6b   :  { %1659 = vperm.xlu0 %2058, %v1645_v37  }
  0x6f   :  { %1683 = vperm.xlu0 %2058, %v1680_v40  }
  0x70   :  { %1966 = vmatmul.mubr.msk.bf16.gmra.mrb[40].mxu0 %vm268_vm1, %v2116_v62 }
  0x71   :  { %2028 = vmatmul.mubr.msk.bf16.gmra.mrb[40].mxu1 %vm268_vm1, %v2117_v63  ;;  %1969 = vmatprep.mubr.msk.bf16.mxu0 %vm268_vm1, %v2118_v0 }
  0x72   :  { %2031 = vmatprep.mubr.msk.bf16.mxu1 %vm268_vm1, %v2119_v1 }
  0x78   :  { %1970 = vmatmul.mubr.msk.bf16.gmra.mrb[44].mxu0 %vm268_vm1, %v2120_v2 }
  0x79   :  { %2032 = vmatmul.mubr.msk.bf16.gmra.mrb[44].mxu1 %vm268_vm1, %v2121_v3  ;;  %1825 = vmatprep.mubr.msk.bf16.mxu0 %vm1307_vm3, %v2124_v5 }
  0x7a   :  { %1831 = vmatprep.mubr.msk.bf16.mxu1 %vm1307_vm3, %v2127_v6 }
  0xf3   :  { %v2512_v15 = vpop.f32.mrb[0].mxu0 }
  0xf4   :  { %v2520_v18 = vpop.f32.mrb[0].mxu1  ;;  %v2522_v19 = vpop.f32.mrb[1].mxu0  ;;  %v575_v9 = vmax.f32 %v2512_v15, 0.0 }
  0xf5   :  { %v2524_v20 = vpop.f32.mrb[1].mxu1  ;;  %v2526_v21 = vpop.f32.mrb[2].mxu0  ;;  %v1179_v11 = vmax.f32 %v2520_v18, 0.0  ;;  %v573_v12 = vmax.f32 %v2522_v19, 0.0 }
  0xf6   :  { %v2528_v22 = vpop.f32.mrb[2].mxu1  ;;  %v2530_v23 = vpop.f32.mrb[3].mxu0  ;;  %v1177_v13 = vmax.f32 %v2524_v20, 0.0  ;;  %v576_v25 = vmax.f32 %v2526_v21, 0.0 }
  0xf7   :  { %v2532_v24 = vpop.f32.mrb[3].mxu1  ;;  %v1180_v26 = vmax.f32 %v2528_v22, 0.0  ;;  %v574_v15 = vmax.f32 %v2530_v23, 0.0 }
  0xf8   :  { %v1178_v21 = vmax.f32 %v2532_v24, 0.0 }
  0xfb   :  { %v2540_v27 = vpop.f32.mrb[4].mxu0 }
  0xfc   :  { %v2548_v30 = vpop.f32.mrb[4].mxu1  ;;  %v2550_v31 = vpop.f32.mrb[5].mxu0  ;;  %v579_v23 = vmax.f32 %v2540_v27, 0.0 }
  0xfd   :  { %v2552_v32 = vpop.f32.mrb[5].mxu1  ;;  %v2554_v33 = vpop.f32.mrb[6].mxu0 }
  0xfe   :  { %v2556_v34 = vpop.f32.mrb[6].mxu1  ;;  %v2558_v35 = vpop.f32.mrb[7].mxu0 }
  0xff   :  { %v2560_v36 = vpop.f32.mrb[7].mxu1 }
 0x103   :  { %v2568_v39 = vpop.f32.mrb[8].mxu0 }
 0x104   :  { %v2570_v41 = vpop.f32.mrb[8].mxu1  ;;  %v2572_v42 = vpop.f32.mrb[9].mxu0 }
 0x105   :  { %v2574_v43 = vpop.f32.mrb[9].mxu1  ;;  %v2576_v44 = vpop.f32.mrb[10].mxu0 }
 0x106   :  { %v2578_v45 = vpop.f32.mrb[10].mxu1  ;;  %v2580_v46 = vpop.f32.mrb[11].mxu0 }
 0x107   :  { %v2582_v47 = vpop.f32.mrb[11].mxu1 }
 0x10b   :  { %v2584_v48 = vpop.f32.mrb[12].mxu0 }
 0x10c   :  { %v2586_v49 = vpop.f32.mrb[12].mxu1  ;;  %v2588_v50 = vpop.f32.mrb[13].mxu0 }
 0x10d   :  { %v2590_v51 = vpop.f32.mrb[13].mxu1  ;;  %v2592_v52 = vpop.f32.mrb[14].mxu0 }
 0x10e   :  { %v2594_v53 = vpop.f32.mrb[14].mxu1  ;;  %v2596_v54 = vpop.f32.mrb[15].mxu0 }
 0x10f   :  { %v2598_v55 = vpop.f32.mrb[15].mxu1 }
 0x113   :  { %v2600_v56 = vpop.f32.mrb[16].mxu0 }
 0x114   :  { %v2602_v57 = vpop.f32.mrb[16].mxu1  ;;  %v2604_v58 = vpop.f32.mrb[17].mxu0 }
 0x115   :  { %v2606_v59 = vpop.f32.mrb[17].mxu1  ;;  %v2608_v60 = vpop.f32.mrb[18].mxu0 }
 0x116   :  { %v2610_v61 = vpop.f32.mrb[18].mxu1  ;;  %v2612_v62 = vpop.f32.mrb[19].mxu0 }
 0x117   :  { %v2614_v63 = vpop.f32.mrb[19].mxu1 }
 0x11b   :  { %v2616_v0 = vpop.f32.mrb[20].mxu0 }
 0x11c   :  { %2778 = vst [vmem:[#allocation6_spill] sm:$0xff] %v2616_v0  ;;  %v2618_v1 = vpop.f32.mrb[20].mxu1  ;;  %v2620_v2 = vpop.f32.mrb[21].mxu0 }
 0x11d   :  { %2779 = vst [vmem:[#allocation7_spill] sm:$0xff] %v2618_v1  ;;  %2780 = vst [vmem:[#allocation8_spill] sm:$0xff] %v2620_v2  ;;  %v2622_v3 = vpop.f32.mrb[21].mxu1  ;;  %v2624_v5 = vpop.f32.mrb[22].mxu0 }
 0x11e   :  { %2781 = vst [vmem:[#allocation9_spill] sm:$0xff] %v2622_v3  ;;  %2782 = vst [vmem:[#allocation10_spill] sm:$0xff] %v2624_v5  ;;  %v2626_v6 = vpop.f32.mrb[22].mxu1  ;;  %v2628_v7 = vpop.f32.mrb[23].mxu0 }
 0x11f   :  { %2783 = vst [vmem:[#allocation11_spill] sm:$0xff] %v2626_v6  ;;  %2784 = vst [vmem:[#allocation12_spill] sm:$0xff] %v2628_v7  ;;  %v2630_v8 = vpop.f32.mrb[23].mxu1 }
 0x120   :  { %2785 = vst [vmem:[#allocation13_spill] sm:$0xff] %v2630_v8 }
 0x123   :  { %v1951_v10 = vpop.f32.mrb[24].mxu0 }
 0x124   :  { %v599_v14 = vmax.f32 %v1951_v10, 0.0  ;;  %v2013_v16 = vpop.f32.mrb[24].mxu1  ;;  %v478_v17 = vpop.f32.mrb[25].mxu0 }
 0x125   :  { %v1203_v28 = vmax.f32 %v2013_v16, 0.0  ;;  %v597_v29 = vmax.f32 %v478_v17, 0.0  ;;  %v1082_v37 = vpop.f32.mrb[25].mxu1  ;;  %v1952_v38 = vpop.f32.mrb[26].mxu0 }
 0x126   :  { %v623_v40 = vmax.f32 %v575_v9, %v599_v14  ;;  %v1201_v4 = vmax.f32 %v1082_v37, 0.0  ;;  %v600_v18 = vmax.f32 %v1952_v38, 0.0  ;;  %v2014_v8 = vpop.f32.mrb[26].mxu1  ;;  %v481_v19 = vpop.f32.mrb[27].mxu0  ;;  %v1183_v9 = vmax.f32 %v2548_v30, 0.0 }
 0x127   :  { %v1227_v7 = vmax.f32 %v1179_v11, %v1203_v28  ;;  %v621_v20 = vmax.f32 %v573_v12, %v597_v29  ;;  %v1204_v10 = vmax.f32 %v2014_v8, 0.0  ;;  %v598_v6 = vmax.f32 %v481_v19, 0.0  ;;  %v1085_v5 = vpop.f32.mrb[27].mxu1 }
 0x128   :  { %v1225_v3 = vmax.f32 %v1177_v13, %v1201_v4  ;;  %v624_v22 = vmax.f32 %v576_v25, %v600_v18  ;;  %v1202_v16 = vmax.f32 %v1085_v5, 0.0  ;;  %v577_v8 = vmax.f32 %v2550_v31, 0.0 }
 0x129   :  { %v1228_v17 = vmax.f32 %v1180_v26, %v1204_v10  ;;  %v622_v2 = vmax.f32 %v574_v15, %v598_v6  ;;  %v1181_v12 = vmax.f32 %v2552_v32, 0.0  ;;  %v580_v5 = vmax.f32 %v2554_v33, 0.0 }
 0x12a   :  { %v646_v1 = vpack.c.bf16 %v624_v22, %v623_v40  ;;  %v1226_v0 = vmax.f32 %v1178_v21, %v1202_v16  ;;  %v1184_v6 = vmax.f32 %v2556_v34, 0.0  ;;  %v578_v30 = vmax.f32 %v2558_v35, 0.0 }
 0x12b   :  { %v1250_v14 = vpack.c.bf16 %v1228_v17, %v1227_v7  ;;  %v645_v37 = vpack.c.bf16 %v622_v2, %v621_v20  ;;  %v1955_v11 = vpop.f32.mrb[28].mxu0  ;;  %v1182_v18 = vmax.f32 %v2560_v36, 0.0  ;;  %v583_v17 = vmax.f32 %v2568_v39, 0.0 }
 0x12c   :  { %v1249_v28 = vpack.c.bf16 %v1226_v0, %v1225_v3  ;;  %v603_v24 = vmax.f32 %v1955_v11, 0.0  ;;  %v2017_v4 = vpop.f32.mrb[28].mxu1  ;;  %v494_v13 = vpop.f32.mrb[29].mxu0  ;;  %v2786_v3 = vmov 0   ;;  %v581_v36 = vmax.f32 %v2572_v42, 0.0 }
 0x12d   :  { %v1207_v25 = vmax.f32 %v2017_v4, 0.0  ;;  %v601_v26 = vmax.f32 %v494_v13, 0.0  ;;  %v1098_v27 = vpop.f32.mrb[29].mxu1  ;;  %v1956_v29 = vpop.f32.mrb[30].mxu0  ;;  %1315 = vmatpush1.bf16.msra.mxu0 %v645_v37  ;;  %v1188_v4 = vmax.f32 %v2578_v45, 0.0 }
 0x12e   :  { %v2647_v2 = vmax.f32 %v579_v23, %v603_v24  ;;  %v1205_v31 = vmax.f32 %v1098_v27, 0.0  ;;  %v604_v7 = vmax.f32 %v1956_v29, 0.0  ;;  %v2018_v32 = vpop.f32.mrb[30].mxu1  ;;  %1422 = vmatpush1.bf16.msra.mxu1 %v1249_v28  ;;  %v497_v0 = vpop.f32.mrb[31].mxu0  ;;  %1316 = vmatprep.subr.bf16.mxu0 %v2786_v3  ;;  %v1187_v23 = vmax.f32 %v2570_v41, 0.0 }
 0x12f   :  { %v1231_v38 = vmax.f32 %v1183_v9, %v1207_v25  ;;  %v625_v33 = vmax.f32 %v577_v8, %v601_v26  ;;  %v1208_v15 = vmax.f32 %v2018_v32, 0.0  ;;  %v602_v34 = vmax.f32 %v497_v0, 0.0  ;;  %v1101_v40 = vpop.f32.mrb[31].mxu1  ;;  %1423 = vmatprep.subr.bf16.mxu1 %v2786_v3 }
 0x130   :  { %v1229_v19 = vmax.f32 %v1181_v12, %v1205_v31  ;;  %v628_v35 = vmax.f32 %v580_v5, %v604_v7  ;;  %v1206_v20 = vmax.f32 %v1101_v40, 0.0  ;;  %v1185_v8 = vmax.f32 %v2574_v43, 0.0 }
 0x131   :  { %v1232_v10 = vmax.f32 %v1184_v6, %v1208_v15  ;;  %v626_v21 = vmax.f32 %v578_v30, %v602_v34  ;;  %1317 = vmatpush1.bf16.msra.mxu0 %v646_v1  ;;  %v582_v6 = vmax.f32 %v2580_v46, 0.0  ;;  %v1186_v31 = vmax.f32 %v2582_v47, 0.0 }
 0x132   :  { %v648_v22 = vpack.c.bf16 %v628_v35, %v2647_v2  ;;  %v1230_v16 = vmax.f32 %v1182_v18, %v1206_v20  ;;  %1424 = vmatpush1.bf16.msra.mxu1 %v1250_v14  ;;  %1318 = vmatprep.subr.bf16.mxu0 %v2786_v3  ;;  %v584_v14 = vmax.f32 %v2576_v44, 0.0  ;;  %v587_v34 = vmax.f32 %v2584_v48, 0.0 }
 0x133   :  { %v1252_v9 = vpack.c.bf16 %v1232_v10, %v1231_v38  ;;  %v647_v37 = vpack.c.bf16 %v626_v21, %v625_v33  ;;  %v1959_v11 = vpop.f32.mrb[32].mxu0  ;;  %1425 = vmatprep.subr.bf16.mxu1 %v2786_v3  ;;  %v1191_v40 = vmax.f32 %v2586_v49, 0.0  ;;  %v585_v47 = vmax.f32 %v2588_v50, 0.0 }
 0x134   :  { %v1251_v1 = vpack.c.bf16 %v1230_v16, %v1229_v19  ;;  %v607_v12 = vmax.f32 %v1959_v11, 0.0  ;;  %v2021_v28 = vpop.f32.mrb[32].mxu1  ;;  %v510_v24 = vpop.f32.mrb[33].mxu0  ;;  %v1189_v20 = vmax.f32 %v2590_v51, 0.0  ;;  %v586_v11 = vmax.f32 %v2596_v54, 0.0 }
 0x135   :  { %v1211_v39 = vmax.f32 %v2021_v28, 0.0  ;;  %v605_v13 = vmax.f32 %v510_v24, 0.0  ;;  %v1114_v41 = vpop.f32.mrb[33].mxu1  ;;  %v1960_v5 = vpop.f32.mrb[34].mxu0  ;;  %1319 = vmatpush1.bf16.msra.mxu0 %v647_v37 }
 0x136   :  { %v2662_v25 = vmax.f32 %v583_v17, %v607_v12  ;;  %v1209_v42 = vmax.f32 %v1114_v41, 0.0  ;;  %v608_v26 = vmax.f32 %v1960_v5, 0.0  ;;  %v2022_v43 = vpop.f32.mrb[34].mxu1  ;;  %1426 = vmatpush1.bf16.msra.mxu1 %v1251_v1  ;;  %v513_v27 = vpop.f32.mrb[35].mxu0  ;;  %1320 = vmatprep.subr.bf16.mxu0 %v2786_v3  ;;  %v588_v17 = vmax.f32 %v2592_v52, 0.0 }
 0x137   :  { %v1235_v29 = vmax.f32 %v1187_v23, %v1211_v39  ;;  %v629_v44 = vmax.f32 %v581_v36, %v605_v13  ;;  %v1212_v30 = vmax.f32 %v2022_v43, 0.0  ;;  %v606_v45 = vmax.f32 %v513_v27, 0.0  ;;  %v1117_v2 = vpop.f32.mrb[35].mxu1  ;;  %1427 = vmatprep.subr.bf16.mxu1 %v2786_v3 }
 0x138   :  { %v1233_v7 = vmax.f32 %v1185_v8, %v1209_v42  ;;  %v632_v46 = vmax.f32 %v584_v14, %v608_v26  ;;  %v1210_v32 = vmax.f32 %v1117_v2, 0.0  ;;  %v1192_v23 = vmax.f32 %v2594_v53, 0.0 }
 0x139   :  { %v1236_v0 = vmax.f32 %v1188_v4, %v1212_v30  ;;  %v630_v38 = vmax.f32 %v582_v6, %v606_v45  ;;  %1321 = vmatpush1.bf16.msra.mxu0 %v648_v22  ;;  %v1190_v14 = vmax.f32 %v2598_v55, 0.0  ;;  %v1195_v42 = vmax.f32 %v2602_v57, 0.0 }
 0x13a   :  { %v650_v33 = vpack.c.bf16 %v632_v46, %v2662_v25  ;;  %v1234_v15 = vmax.f32 %v1186_v31, %v1210_v32  ;;  %1428 = vmatpush1.bf16.msra.mxu1 %v1252_v9  ;;  %1322 = vmatprep.subr.bf16.mxu0 %v2786_v3  ;;  %v591_v25 = vmax.f32 %v2600_v56, 0.0  ;;  %v589_v55 = vmax.f32 %v2604_v58, 0.0 }
 0x13b   :  { %v1254_v18 = vpack.c.bf16 %v1236_v0, %v1235_v29  ;;  %v649_v19 = vpack.c.bf16 %v630_v38, %v629_v44  ;;  %v1963_v35 = vpop.f32.mrb[36].mxu0  ;;  %1429 = vmatprep.subr.bf16.mxu1 %v2786_v3  ;;  %v1193_v29 = vmax.f32 %v2606_v59, 0.0  ;;  %v592_v31 = vmax.f32 %v2608_v60, 0.0 }
 0x13c   :  { %v1253_v10 = vpack.c.bf16 %v1234_v15, %v1233_v7  ;;  %v611_v21 = vmax.f32 %v1963_v35, 0.0  ;;  %v2025_v22 = vpop.f32.mrb[36].mxu1  ;;  %v526_v16 = vpop.f32.mrb[37].mxu0  ;;  %v1196_v7 = vmax.f32 %v2610_v61, 0.0  ;;  %v590_v0 = vmax.f32 %v2612_v62, 0.0 }
 0x13d   :  { %v1215_v48 = vmax.f32 %v2025_v22, 0.0  ;;  %v609_v9 = vmax.f32 %v526_v16, 0.0  ;;  %v1130_v49 = vpop.f32.mrb[37].mxu1  ;;  %v1964_v37 = vpop.f32.mrb[38].mxu0  ;;  %1323 = vmatpush1.bf16.msra.mxu0 %v649_v19  ;;  %v1194_v19 = vmax.f32 %v2614_v63, 0.0  ;;  %v2787_v16 = vld [vmem:[#allocation6_spill] sm:$0xff] }
 0x13e   :  { %v2677_v36 = vmax.f32 %v587_v34, %v611_v21  ;;  %v1213_v50 = vmax.f32 %v1130_v49, 0.0  ;;  %v612_v8 = vmax.f32 %v1964_v37, 0.0  ;;  %v2026_v51 = vpop.f32.mrb[38].mxu1  ;;  %1430 = vmatpush1.bf16.msra.mxu1 %v1253_v10  ;;  %v529_v1 = vpop.f32.mrb[39].mxu0  ;;  %1324 = vmatprep.subr.bf16.mxu0 %v2786_v3  ;;  %v2789_v63 = vld [vmem:[#allocation8_spill] sm:$0xff] }
 0x13f   :  { %v1239_v12 = vmax.f32 %v1191_v40, %v1215_v48  ;;  %v633_v52 = vmax.f32 %v585_v47, %v609_v9  ;;  %v1216_v28 = vmax.f32 %v2026_v51, 0.0  ;;  %v610_v53 = vmax.f32 %v529_v1, 0.0  ;;  %v1133_v24 = vpop.f32.mrb[39].mxu1  ;;  %1431 = vmatprep.subr.bf16.mxu1 %v2786_v3 }
 0x140   :  { %v1237_v4 = vmax.f32 %v1189_v20, %v1213_v50  ;;  %v636_v54 = vmax.f32 %v588_v17, %v612_v8  ;;  %v1214_v39 = vmax.f32 %v1133_v24, 0.0  ;;  %v595_v17 = vmax.f32 %v2787_v16, 0.0 }
 0x141   :  { %v1240_v13 = vmax.f32 %v1192_v23, %v1216_v28  ;;  %v634_v41 = vmax.f32 %v586_v11, %v610_v53  ;;  %1325 = vmatpush1.bf16.msra.mxu0 %v650_v33  ;;  %v2788_v23 = vld [vmem:[#allocation7_spill] sm:$0xff]  ;;  %v593_v11 = vmax.f32 %v2789_v63, 0.0 }
 0x142   :  { %v652_v5 = vpack.c.bf16 %v636_v54, %v2677_v36  ;;  %v1238_v6 = vmax.f32 %v1190_v14, %v1214_v39  ;;  %1432 = vmatpush1.bf16.msra.mxu1 %v1254_v18  ;;  %1326 = vmatprep.subr.bf16.mxu0 %v2786_v3  ;;  %v1199_v48 = vmax.f32 %v2788_v23, 0.0  ;;  %v2790_v36 = vld [vmem:[#allocation9_spill] sm:$0xff]  ;;  %v2792_v53 = vld [vmem:[#allocation11_spill] sm:$0xff] }
 0x143   :  { %v1256_v26 = vpack.c.bf16 %v1240_v13, %v1239_v12  ;;  %v651_v43 = vpack.c.bf16 %v634_v41, %v633_v52  ;;  %v1967_v27 = vpop.f32.mrb[40].mxu0  ;;  %1433 = vmatprep.subr.bf16.mxu1 %v2786_v3  ;;  %v1197_v50 = vmax.f32 %v2790_v36, 0.0  ;;  %v2791_v52 = vld [vmem:[#allocation10_spill] sm:$0xff]  ;;  %v1200_v24 = vmax.f32 %v2792_v53, 0.0  ;;  %v2793_v13 = vld [vmem:[#allocation12_spill] sm:$0xff] }
 0x144   :  { %v1255_v44 = vpack.c.bf16 %v1238_v6, %v1237_v4  ;;  %v615_v30 = vmax.f32 %v1967_v27, 0.0  ;;  %v2029_v45 = vpop.f32.mrb[40].mxu1  ;;  %v542_v2 = vpop.f32.mrb[41].mxu0  ;;  %v596_v28 = vmax.f32 %v2791_v52, 0.0  ;;  %v594_v41 = vmax.f32 %v2793_v13, 0.0 }
 0x145   :  { %v1219_v56 = vmax.f32 %v2029_v45, 0.0  ;;  %v613_v46 = vmax.f32 %v542_v2, 0.0  ;;  %v1146_v57 = vpop.f32.mrb[41].mxu1  ;;  %v1968_v32 = vpop.f32.mrb[42].mxu0  ;;  %1327 = vmatpush1.bf16.msra.mxu0 %v651_v43 }
 0x146   :  { %v2692_v38 = vmax.f32 %v591_v25, %v615_v30  ;;  %v1217_v58 = vmax.f32 %v1146_v57, 0.0  ;;  %v616_v33 = vmax.f32 %v1968_v32, 0.0  ;;  %v2030_v59 = vpop.f32.mrb[42].mxu1  ;;  %1434 = vmatpush1.bf16.msra.mxu1 %v1255_v44  ;;  %v545_v15 = vpop.f32.mrb[43].mxu0  ;;  %1328 = vmatprep.subr.bf16.mxu0 %v2786_v3  ;;  %v2794_v30 = vld [vmem:[#allocation13_spill] sm:$0xff] }
 0x147   :  { %v1243_v34 = vmax.f32 %v1195_v42, %v1219_v56  ;;  %v637_v60 = vmax.f32 %v589_v55, %v613_v46  ;;  %v1220_v40 = vmax.f32 %v2030_v59, 0.0  ;;  %v614_v61 = vmax.f32 %v545_v15, 0.0  ;;  %v1149_v18 = vpop.f32.mrb[43].mxu1  ;;  %1435 = vmatprep.subr.bf16.mxu1 %v2786_v3  ;;  %v2125_v59 = vld [vmem:[%s2768_s6] ss:$8 sps:$4 sm:$0xff]  }
 0x148   :  { %v1241_v35 = vmax.f32 %v1193_v29, %v1217_v58  ;;  %v640_v62 = vmax.f32 %v592_v31, %v616_v33  ;;  %v1218_v47 = vmax.f32 %v1149_v18, 0.0  ;;  %v1198_v45 = vmax.f32 %v2794_v30, 0.0  ;;  %v2122_v33 = vld [vmem:[%s2766_s4] ss:$8 sps:$4 sm:$0xff]   ;;  %v2128_v15 = vld [vmem:[%s2766_s4 + $0x14] ss:$8 sps:$4 sm:$0xff]   ;;  %v1272_v18 = vpop.permute.xlu0 %1271 }
 0x149   :  { %v1244_v20 = vmax.f32 %v1196_v7, %v1220_v40  ;;  %v638_v10 = vmax.f32 %v590_v0, %v614_v61  ;;  %1329 = vmatpush1.bf16.msra.mxu0 %v652_v5  ;;  %v2134_v40 = vld [vmem:[%s2771_s9] sm:$0xff]  }
 0x14a   :  { %v654_v21 = vpack.c.bf16 %v640_v62, %v2692_v38  ;;  %v1242_v22 = vmax.f32 %v1194_v19, %v1218_v47  ;;  %1436 = vmatpush1.bf16.msra.mxu1 %v1256_v26  ;;  %1330 = vmatprep.subr.bf16.mxu0 %v2786_v3  ;;  %v2135_v61 = vld [vmem:[%s2770_s8] sm:$0xff]   ;;  %v1380_v19 = vpop.permute.xlu1 %1379 }
 0x14b   :  { %v1258_v9 = vpack.c.bf16 %v1244_v20, %v1243_v34  ;;  %v653_v49 = vpack.c.bf16 %v638_v10, %v637_v60  ;;  %v1971_v37 = vpop.f32.mrb[44].mxu0  ;;  %1437 = vmatprep.subr.bf16.mxu1 %v2786_v3  ;;  %v2131_v34 = vld [vmem:[%s2768_s6 + $0x14] ss:$8 sps:$4 sm:$0xff]   ;;  %v2133_v60 = vld [vmem:[%s2768_s6 + $0x10] ss:$8 sps:$4 sm:$0xff]  }
 0x14c   :  { %v1257_v8 = vpack.c.bf16 %v1242_v22, %v1241_v35  ;;  %v619_v51 = vmax.f32 %v1971_v37, 0.0  ;;  %v2033_v1 = vpop.f32.mrb[44].mxu1  ;;  %v558_v12 = vpop.f32.mrb[45].mxu0 }
 0x14d   :  { %v1223_v14 = vmax.f32 %v2033_v1, 0.0  ;;  %v617_v4 = vmax.f32 %v558_v12, 0.0  ;;  %v1162_v54 = vpop.f32.mrb[45].mxu1  ;;  %v1972_v39 = vpop.f32.mrb[46].mxu0  ;;  %1331 = vmatpush1.bf16.msra.mxu0 %v653_v49 }
 0x14e   :  { %v643_v5 = vmax.f32 %v595_v17, %v619_v51  ;;  %v1221_v6 = vmax.f32 %v1162_v54, 0.0  ;;  %v620_v25 = vmax.f32 %v1972_v39, 0.0  ;;  %v2034_v42 = vpop.f32.mrb[46].mxu1  ;;  %1438 = vmatpush1.bf16.msra.mxu1 %v1257_v8  ;;  %v561_v26 = vpop.f32.mrb[47].mxu0  ;;  %1332 = vmatprep.subr.bf16.mxu0 %v2786_v3 }
 0x14f   :  { %v1247_v43 = vmax.f32 %v1199_v48, %v1223_v14  ;;  %v641_v27 = vmax.f32 %v593_v11, %v617_v4  ;;  %v1224_v55 = vmax.f32 %v2034_v42, 0.0  ;;  %v618_v29 = vmax.f32 %v561_v26, 0.0  ;;  %v1165_v44 = vpop.f32.mrb[47].mxu1  ;;  %1439 = vmatprep.subr.bf16.mxu1 %v2786_v3  ;;  %v1277_v35 = vpop.permute.xlu0 %1276 }
 0x150   :  { %v1245_v2 = vmax.f32 %v1197_v50, %v1221_v6  ;;  %v644_v31 = vmax.f32 %v596_v28, %v620_v25  ;;  %v1222_v7 = vmax.f32 %v1165_v44, 0.0  ;;  %v1385_v62 = vpop.permute.xlu1 %1384 }
 0x151   :  { %v1248_v56 = vmax.f32 %v1200_v24, %v1224_v55  ;;  %v642_v46 = vmax.f32 %v594_v41, %v618_v29  ;;  %1333 = vmatpush1.bf16.msra.mxu0 %v654_v21  ;;  %v2137_v55 = vld [vmem:[%s2770_s8 + $0x8] sm:$0xff]   ;;  %s2168_s8 = smov [#allocation3]  }
 0x152   :  { %v656_v57 = vpack.c.bf16 %v644_v31, %v643_v5  ;;  %v1246_v32 = vmax.f32 %v1198_v45, %v1222_v7  ;;  %1440 = vmatpush1.bf16.msra.mxu1 %v1258_v9  ;;  %1334 = vmatprep.subr.bf16.mxu0 %v2786_v3 }
 0x153   :  { %v1260_v0 = vpack.c.bf16 %v1248_v56, %v1247_v43  ;;  %v655_v38 = vpack.c.bf16 %v642_v46, %v641_v27  ;;  %1441 = vmatprep.subr.bf16.mxu1 %v2786_v3  ;;  %v1282_v47 = vpop.permute.xlu0 %1281  ;;  %v2136_v27 = vld [vmem:[%s2771_s9 + $0x8] sm:$0xff]   ;;  %s1703_s9 = sshll.u32 %s2168_s8, 4  ;;  %s1704_s9 = int_to_ptr.vmem [resolvable:$true] %s1703_s9 }
 0x154   :  { %v1259_v58 = vpack.c.bf16 %v1246_v32, %v1245_v2  ;;  %v1287_v10 = vpop.permute.xlu1 %1286  ;;  %s2142_s12 = scalar_lea.vmem %s1704_s9, 16  ;;  %s2146_s18 = scalar_lea.vmem %s1704_s9, 32 }
 0x155   :  { %1335 = vmatpush1.bf16.msra.mxu0 %v655_v38  ;;  %p2143_p0 = scmp.ne.s32.totalorder %s1704_s9, %s2142_s12  ;;  %p2147_p1 = scmp.lt.s32.totalorder %s1704_s9, %s1704_s9 }
 0x156   :  { %1442 = vmatpush1.bf16.msra.mxu1 %v1259_v58  ;;  %1336 = vmatprep.subr.bf16.mxu0 %v2786_v3  ;;  %p2148_p2 = scmp.lt.s32.totalorder %s2146_s18, %s2142_s12 }
 0x157   :  { %1443 = vmatprep.subr.bf16.mxu1 %v2786_v3  ;;  %v2130_v3 = vld [vmem:[%s2766_s4 + $0x10] ss:$8 sps:$4 sm:$0xff]   ;;  %v1390_v1 = vpop.permute.xlu0 %1389 }
 0x158   :  { %v1395_v52 = vpop.permute.xlu1 %1394  ;;  %p2149_p3 = por %p2148_p2, %p2147_p1 }
 0x159   :  { %1337 = vmatpush1.bf16.msra.mxu0 %v656_v57 }
 0x15a   :  { %1444 = vmatpush1.bf16.msra.mxu1 %v1260_v0  ;;  %p2150_p4 = pnand %p2149_p3, %p2143_p0 }
 0x15b   :  { %v1618_v29 = vpop.permute.xlu0 %1617 }
 0x15c   :  { %1347 = vmatmul.mubr.bf16.vlgmr.msra.gmra.mrb[48].mxu0 %v2122_v33  ;;  %v1623_v44 = vpop.permute.xlu1 %1622 }
 0x15d   :  { %1454 = vmatmul.mubr.bf16.vlgmr.msra.gmra.mrb[48].mxu1 %v2125_v59  ;;  %1826 = vmatprep.mubr.msk.bf16.mxu0 %vm1307_vm3, %v2128_v15 }
 0x15e   :  { %1832 = vmatprep.mubr.msk.bf16.mxu1 %vm1307_vm3, %v2131_v34 }
 0x15f   :  { %v1628_v30 = vpop.permute.xlu0 %1627 }
 0x160   :  { %v1633_v45 = vpop.permute.xlu1 %1632 }
 0x164   :  { %1355 = vmatmul.mubr.bf16.gmra.mrb[52].mxu0 %v2130_v3  ;;  %v1650_v3 = vpop.permute.xlu0 %1649 }
 0x165   :  { %1462 = vmatmul.mubr.bf16.gmra.mrb[52].mxu1 %v2133_v60  ;;  %2047 = vmatprep.mubr.msk.bf16.mxu0 %vm1490_vm4, %v2135_v61 }
 0x166   :  { %2039 = vmatprep.mubr.msk.bf16.mxu1 %vm1490_vm4, %v2134_v40 }
 0x22f   :  { %v1348_v20 = vpop.f32.mrb[48].mxu0 }
 0x230   :  { %v1349_v21 = vadd.f32 %v1348_v20, %v1272_v18  ;;  %v1350_v22 = vpop.f32.mrb[49].mxu0  ;;  %v1455_v16 = vpop.f32.mrb[48].mxu1 }
 0x231   :  { %v1351_v17 = vpop.f32.mrb[50].mxu0  ;;  %v1457_v23 = vpop.f32.mrb[49].mxu1  ;;  %v1456_v37 = vadd.f32 %v1455_v16, %v1380_v19 }
 0x232   :  { %v1352_v48 = vadd.f32 %v1351_v17, %v1277_v35  ;;  %v1353_v9 = vpop.f32.mrb[51].mxu0  ;;  %v1458_v49 = vpop.f32.mrb[50].mxu1  ;;  %v1363_v36 = vmax.f32 %v1349_v21, 0.0 }
 0x233   :  { %v1459_v63 = vadd.f32 %v1458_v49, %v1385_v62  ;;  %v1460_v11 = vpop.f32.mrb[51].mxu1  ;;  %v1655_v18 = vpop.permute.xlu1 %1654 }
 0x234   :  { %v1364_v50 = vmax.f32 %v1352_v48, 0.0  ;;  %v1686_v48 = vlaneseq }
 0x235   :  { %v1470_v8 = vpack.c.bf16 %v1459_v63, %v1456_v37 }
 0x236   :  { %v1367_v51 = vpack.c.bf16 %v1364_v50, %v1363_v36  ;;  %v1687_v37 = vshrl.u32 %v1686_v48, 7 }
 0x237   :  { %v1356_v12 = vpop.f32.mrb[52].mxu0  ;;  %2035 = vmatprep.subr.bf16.mxu1 %v1470_v8  ;;  %v1665_v16 = vpop.permute.xlu1 %1664 }
 0x238   :  { %v1357_v28 = vadd.f32 %v1356_v12, %v1282_v47  ;;  %v1358_v53 = vpop.f32.mrb[53].mxu0  ;;  %v1463_v24 = vpop.f32.mrb[52].mxu1  ;;  %2043 = vmatprep.subr.bf16.mxu0 %v1367_v51  ;;  %2036 = vmatpush3.bf16.msra.mxu1 %v1470_v8  ;;  %v1688_v36 = vsub.s32 0, %v1687_v37 }
 0x239   :  { %v1359_v14 = vpop.f32.mrb[54].mxu0  ;;  %v1465_v4 = vpop.f32.mrb[53].mxu1  ;;  %2044 = vmatpush3.bf16.msra.mxu0 %v1367_v51  ;;  %v1464_v41 = vadd.f32 %v1463_v24, %v1390_v1 }
 0x23a   :  { %v1360_v54 = vadd.f32 %v1359_v14, %v1287_v10  ;;  %v1466_v39 = vpop.f32.mrb[54].mxu1  ;;  %v1361_v13 = vpop.f32.mrb[55].mxu0  ;;  %v1365_v25 = vmax.f32 %v1357_v28, 0.0 }
 0x23b   :  { %v1467_v5 = vadd.f32 %v1466_v39, %v1395_v52  ;;  %v1468_v6 = vpop.f32.mrb[55].mxu1  ;;  %v1660_v10 = vpop.permute.xlu0 %1659 }
 0x23c   :  { %v1366_v42 = vmax.f32 %v1360_v54, 0.0 }
 0x23d   :  { %v1471_v26 = vpack.c.bf16 %v1467_v5, %v1464_v41 }
 0x23e   :  { %v1368_v43 = vpack.c.bf16 %v1366_v42, %v1365_v25 }
 0x23f   :  { %2037 = vmatprep.subr.bf16.mxu1 %v1471_v26  ;;  %v1684_v8 = vpop.permute.xlu0 %1683 }
 0x240   :  { %2045 = vmatprep.subr.bf16.mxu0 %v1368_v43  ;;  %2038 = vmatpush3.bf16.msra.mxu1 %v1471_v26  ;;  %v1689_v1 = vrot.slane %v1684_v8, %v1688_v36 }
 0x241   :  { %2046 = vmatpush3.bf16.msra.mxu0 %v1368_v43 }
 0x243   :  { %2040 = vmatmul.mubr.msk.bf16.vlgmr.msra.gmra.mrb[56].mxu1 %vm1490_vm4, %v2136_v27 }
 0x244   :  { %2048 = vmatmul.mubr.msk.bf16.vlgmr.msra.gmra.mrb[56].mxu0 %vm1490_vm4, %v2137_v55 }
 0x316   :  { %v2041_v2 = vpop.f32.mrb[56].mxu1 }
 0x317   :  { %v2049_v31 = vpop.f32.mrb[56].mxu0  ;;  %v1531_v7 = vpop.f32.mrb[57].mxu1 }
 0x318   :  { %v1605_v56 = vadd.f32 %v2049_v31, %v2041_v2  ;;  %v1596_v46 = vpop.f32.mrb[57].mxu0  ;;  %v2042_v57 = vpop.f32.mrb[58].mxu1 }
 0x319   :  { %v1597_v32 = vadd.f32 %v1596_v46, %v1531_v7  ;;  %v2050_v0 = vpop.f32.mrb[58].mxu0  ;;  %v1534_v38 = vpop.f32.mrb[59].mxu1 }
 0x31a   :  { %v1608_v58 = vadd.f32 %v2050_v0, %v2042_v57  ;;  %v1599_v33 = vpop.f32.mrb[59].mxu0  ;;  %v1637_v59 = vadd.f32 %v1628_v30, %v1605_v56 }
 0x31b   :  { %v1635_v15 = vadd.f32 %v1618_v29, %v1597_v32  ;;  %v1600_v34 = vadd.f32 %v1599_v33, %v1534_v38 }
 0x31c   :  { %v1638_v40 = vadd.f32 %v1633_v45, %v1608_v58  ;;  %v1641_v19 = vmax.f32 %v1637_v59, 0.0 }
 0x31d   :  { %v1639_v60 = vmax.f32 %v1635_v15, 0.0  ;;  %v1636_v61 = vadd.f32 %v1623_v44, %v1600_v34 }
 0x31e   :  { %v1642_v47 = vmax.f32 %v1638_v40, 0.0  ;;  %v1669_v21 = vmul.f32 %v1660_v10, %v1641_v19 }
 0x31f   :  { %v1640_v35 = vmax.f32 %v1636_v61, 0.0  ;;  %v1667_v62 = vmul.f32 %v1650_v3, %v1639_v60 }
 0x320   :  { %v1670_v17 = vmul.f32 %v1665_v16, %v1642_v47 }
 0x321   :  { %v1668_v20 = vmul.f32 %v1655_v18, %v1640_v35 }
 0x323   :  { %v1671_v22 = vadd.f32 %v1668_v20, %v1667_v62 }
 0x325   :  { %v1672_v23 = vadd.f32 %v1671_v22, %v1669_v21 }
 0x327   :  { %v1673_v9 = vadd.f32 %v1672_v23, %v1670_v17 }
 0x329   :  { %v1674_v49 = vrot.slane %v1673_v9, 4 }
 0x32b   :  { %v1675_v63 = vadd.f32 %v1674_v49, %v1673_v9 }
 0x32d   :  { %v1676_v11 = vrot.slane %v1675_v63, 2 }
 0x32f   :  { %v1677_v50 = vadd.f32 %v1676_v11, %v1675_v63 }
 0x331   :  { %v1678_v51 = vrot.slane %v1677_v50, 1 }
 0x333   :  { %v1679_v12 = vadd.f32 %v1678_v51, %v1677_v50 }
 0x335   :  { %v1690_v52 = vadd.f32 %v1689_v1, %v1679_v12 }
 0x337   :  { %v1691_v28 = vsub.f32 0.0, %v1690_v52 }
 0x339   :  { %v1692_v53 = vmul.f32 1.442695, %v1691_v28 }
 0x33b   :  { %2138 = vpow2.f32 %v1692_v53 }
 0x345   :  { %v2139_v24 = vpop.eup %2138 }
 0x346   :  { %v1694_v14 = vadd.f32 1.0, %v2139_v24 }
 0x348   :  { %2140 = vrcp.f32 %v1694_v14 }
 0x352   :  { %v2141_v4 = vpop.eup %2140 }
 0x353   :  { %1696 = vst [vmem:[#allocation3] sm:$0x1] %v2141_v4 }
 0x354   :  { %2153 = shalt.err (!%p2150_p4)
}
 0x355   :  { %s2154_s10 = scalar_lea.hbm %s2775_s13, 16 }
 0x356   :  { %p2155_p5 = scmp.ne.s32.totalorder %s2775_s13, %s2154_s10  ;;  %p2158_p6 = scmp.lt.u32.totalorder %s2154_s10, %s2775_s13 }
 0x358   :  { %p2160_p7 = pnand %p2158_p6, %p2155_p5 }
 0x35a   :  { %2163 = shalt.err (!%p2160_p7)
}
 0x35b   :  { %1706 = dma.vmem_to_hbm [thread:$0]  %s1704_s9, 16, %s2775_s13, [#allocation4]  }
 0x35c   :  { %2164 = dma.done.wait [#allocation4], 16  }
 0x35d   :  { %2165 = vsyncadd [#allocation4], 4294967280 }
 0x35e   :  { %1710 = vsyncpa [#allocation4], 1 }

</bundles_post_ra>
